<compile_context>
chip_gen: v6e
topology: v6e:2x2x1
jax: 0.10.0
libtpu: 0.0.40
codegen_flags: <defaults>
</compile_context>

<pallas_src>
import math
import functools

import jax
import jax.numpy as jnp
import numpy as np
from jax.experimental import pallas as pl
from jax.experimental.pallas import tpu as pltpu


def timestep_encoder_kernel(t_ref, pos_ref, wt_ref, b_ref, out_ref, *, Bt, hidden):
    """One grid step: gather Bt table rows (in vregs) and project them.

    t_ref   : SMEM (B_pad,)            int32  -- scalar-prefetched timesteps
    pos_ref : VMEM (max_time, hidden)  f32    -- sinusoidal table (resident)
    wt_ref  : VMEM (hidden, embed)     f32    -- proj weight, pre-transposed
    b_ref   : VMEM (1, embed)          f32    -- proj bias
    out_ref : VMEM (Bt, embed)         f32
    """
    base = pl.program_id(0) * Bt
    # Sublane index column, hoisted out of the loops (broadcasts are not CSE'd).
    sub = jax.lax.broadcasted_iota(jnp.int32, (8, 1), 0)

    # Build the (Bt, hidden) operand as a *value* (no scratch store->reload):
    # gather 8 rows into an (8, hidden) chunk via sublane selects, then do an
    # 8-aligned sublane concatenation of the chunks.
    chunks = []
    for c in range(0, Bt, 8):
        chunk = jnp.zeros((8, hidden), jnp.float32)
        for j in range(8):
            idx = t_ref[base + c + j]                 # SMEM scalar read
            row = pos_ref[pl.ds(idx, 1), :]           # (1, hidden) dynamic-row load
            chunk = jnp.where(sub == j, row, chunk)   # place row at sublane j
        chunks.append(chunk)
    emb = chunks[0] if len(chunks) == 1 else jnp.concatenate(chunks, axis=0)

    # Single MXU matmul for the whole block + bias add, lane-dense store.
    out_ref[...] = (
        jnp.dot(emb, wt_ref[...], preferred_element_type=jnp.float32) + b_ref[...]
    )


def timestep_encoder(t, pos_enc, w, b, *, block_b=128):
    """t: (B,) int;  pos_enc: (max_time, hidden);  w: (embed, hidden);  b: (embed,)."""
    B = int(t.shape[0])
    max_time, hidden = pos_enc.shape
    embed = w.shape[0]

    # Round the batch up to a sublane multiple; collapse to one grid step for
    # small batches, 128-row blocks beyond that.
    B_pad8 = pl.cdiv(max(B, 1), 8) * 8
    Bt = B_pad8 if B_pad8 <= block_b else block_b
    B_pad = pl.cdiv(B_pad8, Bt) * Bt
    n_blocks = B_pad // Bt

    # Clamp (PyTorch would raise on OOB; Pallas would silently read garbage)
    # and pad with index 0 (valid row); padded outputs are sliced away below.
    t_i32 = jnp.clip(t.astype(jnp.int32), 0, max_time - 1)
    t_i32 = jnp.zeros((B_pad,), jnp.int32).at[:B].set(t_i32)

    wt = jnp.transpose(w)          # (hidden, embed)
    b2 = b.reshape(1, embed)

    grid_spec = pltpu.PrefetchScalarGridSpec(
        num_scalar_prefetch=1,
        grid=(n_blocks,),
        in_specs=[
            pl.BlockSpec((max_time, hidden), lambda i, t_ref: (0, 0)),  # table
            pl.BlockSpec((hidden, embed), lambda i, t_ref: (0, 0)),     # W^T
            pl.BlockSpec((1, embed), lambda i, t_ref: (0, 0)),          # bias
        ],
        out_specs=pl.BlockSpec((Bt, embed), lambda i, t_ref: (i, 0)),
    )

    # Double-buffered constants + output block, with headroom; clamp to a
    # value that is safe on all generations (>= v5e's 16 MiB default,
    # <= v7x's 64 MiB physical VMEM).
    vmem_need = 4 * 2 * (max_time * hidden + hidden * embed + embed + Bt * embed)
    vmem_limit = int(min(max(vmem_need + (4 << 20), 16 << 20), 64 << 20))

    cost = pl.CostEstimate(
        flops=2 * B_pad * hidden * embed,
        transcendentals=0,
        bytes_accessed=4 * (B_pad * hidden + hidden * embed + embed + B_pad * embed),
    )

    out = pl.pallas_call(
        functools.partial(timestep_encoder_kernel, Bt=Bt, hidden=hidden),
        out_shape=jax.ShapeDtypeStruct((B_pad, embed), jnp.float32),
        grid_spec=grid_spec,
        compiler_params=pltpu.CompilerParams(
            # Work per step is trivial: never split it across v7x's two TCs.
            dimension_semantics=("arbitrary",),
            vmem_limit_bytes=vmem_limit,
        ),
        cost_estimate=cost,
    )(t_i32, pos_enc, wt, b2)
    return out[:B]


def make_pos_enc(max_time, hidden_dim):
    """Same construction as the PyTorch module's self.pos_enc."""
    position = jnp.arange(max_time, dtype=jnp.float32)[:, None]
    div_term = jnp.exp(
        jnp.arange(0, hidden_dim, 2, dtype=jnp.float32)
        * -(math.log(10000.0) / hidden_dim))
    pe = jnp.zeros((max_time, hidden_dim), jnp.float32)
    pe = pe.at[:, 0::2].set(jnp.sin(position * div_term))
    pe = pe.at[:, 1::2].set(jnp.cos(position * div_term))
    return pe


def reference(t, pos_enc, w, b):
    return pos_enc[t] @ w.T + b[None, :]


if __name__ == "__main__":
    # Small shapes consistent with the module defaults (hidden=256, embed=128).
    max_time, hidden_dim, embed_dim, B = 100, 256, 128, 16

    key = jax.random.PRNGKey(0)
    k_t, k_w, k_b = jax.random.split(key, 3)

    pos_enc = make_pos_enc(max_time, hidden_dim)
    bound = 1.0 / math.sqrt(hidden_dim)        # nn.Linear default init range
    w = jax.random.uniform(k_w, (embed_dim, hidden_dim), jnp.float32, -bound, bound)
    b = jax.random.uniform(k_b, (embed_dim,), jnp.float32, -bound, bound)
    t = jax.random.randint(k_t, (B,), 0, max_time, jnp.int32)

    out = jax.block_until_ready(timestep_encoder(t, pos_enc, w, b))
    ref = jax.block_until_ready(reference(t, pos_enc, w, b))

    assert out.shape == (B, embed_dim)
    np.testing.assert_allclose(np.asarray(out), np.asarray(ref), rtol=1e-5, atol=1e-5)
    print("KERNEL_OK")
</pallas_src>

<mosaic_0001>
module attributes {stable_mosaic.version = 11 : i64} {
  func.func @timestep_encoder_kernel(%arg0: i32, %arg1: memref<16xi32, #tpu.memory_space<smem>>, %arg2: memref<100x256xf32, #tpu.memory_space<vmem>>, %arg3: memref<256x128xf32, #tpu.memory_space<vmem>>, %arg4: memref<1x128xf32, #tpu.memory_space<vmem>>, %arg5: memref<16x128xf32, #tpu.memory_space<vmem>>) attributes {dimension_semantics = [#tpu.dimension_semantics<arbitrary>], iteration_bounds = array<i64: 1>, scalar_prefetch = 1 : i64, scratch_operands = 0 : i64, tpu.core_type = #tpu.core_type<tc>, window_params = [{pipeline_mode = #tpu.pipeline_mode<synchronous>, transform_indices = @transform_0, window_bounds = array<i64: 100, 256>}, {pipeline_mode = #tpu.pipeline_mode<synchronous>, transform_indices = @transform_1, window_bounds = array<i64: 256, 128>}, {pipeline_mode = #tpu.pipeline_mode<synchronous>, transform_indices = @transform_2, window_bounds = array<i64: 1, 128>}, {transform_indices = @transform_3, window_bounds = array<i64: 16, 128>}]} {
    %c16_i32 = arith.constant 16 : i32
    %0 = arith.muli %arg0, %c16_i32 : i32
    %1 = tpu.iota {dimensions = array<i32: 0>} : vector<8x1xi32>
    %cst = arith.constant 0.000000e+00 : f32
    %2 = vector.broadcast %cst : f32 to vector<8x256xf32>
    %c0_i32 = arith.constant 0 : i32
    %3 = arith.addi %0, %c0_i32 : i32
    %c0_i32_0 = arith.constant 0 : i32
    %4 = arith.addi %3, %c0_i32_0 : i32
    %5 = arith.index_cast %4 : i32 to index
    %6 = memref.load %arg1[%5] : memref<16xi32, #tpu.memory_space<smem>>
    %7 = arith.index_cast %6 : i32 to index
    %c0 = arith.constant 0 : index
    %8 = vector.load %arg2[%7, %c0] : memref<100x256xf32, #tpu.memory_space<vmem>>, vector<1x256xf32>
    %c0_i32_1 = arith.constant 0 : i32
    %9 = vector.broadcast %c0_i32_1 : i32 to vector<8x1xi32>
    %10 = arith.cmpi eq, %1, %9 : vector<8x1xi32>
    %11 = vector.shape_cast %10 : vector<8x1xi1> to vector<8x1xi1>
    %12 = vector.broadcast %11 : vector<8x1xi1> to vector<8x256xi1>
    %13 = vector.shape_cast %8 : vector<1x256xf32> to vector<1x256xf32>
    %14 = vector.broadcast %13 : vector<1x256xf32> to vector<8x256xf32>
    %15 = arith.select %12, %14, %2 : vector<8x256xi1>, vector<8x256xf32>
    %c0_i32_2 = arith.constant 0 : i32
    %16 = arith.addi %0, %c0_i32_2 : i32
    %c1_i32 = arith.constant 1 : i32
    %17 = arith.addi %16, %c1_i32 : i32
    %18 = arith.index_cast %17 : i32 to index
    %19 = memref.load %arg1[%18] : memref<16xi32, #tpu.memory_space<smem>>
    %20 = arith.index_cast %19 : i32 to index
    %c0_3 = arith.constant 0 : index
    %21 = vector.load %arg2[%20, %c0_3] : memref<100x256xf32, #tpu.memory_space<vmem>>, vector<1x256xf32>
    %c1_i32_4 = arith.constant 1 : i32
    %22 = vector.broadcast %c1_i32_4 : i32 to vector<8x1xi32>
    %23 = arith.cmpi eq, %1, %22 : vector<8x1xi32>
    %24 = vector.shape_cast %23 : vector<8x1xi1> to vector<8x1xi1>
    %25 = vector.broadcast %24 : vector<8x1xi1> to vector<8x256xi1>
    %26 = vector.shape_cast %21 : vector<1x256xf32> to vector<1x256xf32>
    %27 = vector.broadcast %26 : vector<1x256xf32> to vector<8x256xf32>
    %28 = arith.select %25, %27, %15 : vector<8x256xi1>, vector<8x256xf32>
    %c0_i32_5 = arith.constant 0 : i32
    %29 = arith.addi %0, %c0_i32_5 : i32
    %c2_i32 = arith.constant 2 : i32
    %30 = arith.addi %29, %c2_i32 : i32
    %31 = arith.index_cast %30 : i32 to index
    %32 = memref.load %arg1[%31] : memref<16xi32, #tpu.memory_space<smem>>
    %33 = arith.index_cast %32 : i32 to index
    %c0_6 = arith.constant 0 : index
    %34 = vector.load %arg2[%33, %c0_6] : memref<100x256xf32, #tpu.memory_space<vmem>>, vector<1x256xf32>
    %c2_i32_7 = arith.constant 2 : i32
    %35 = vector.broadcast %c2_i32_7 : i32 to vector<8x1xi32>
    %36 = arith.cmpi eq, %1, %35 : vector<8x1xi32>
    %37 = vector.shape_cast %36 : vector<8x1xi1> to vector<8x1xi1>
    %38 = vector.broadcast %37 : vector<8x1xi1> to vector<8x256xi1>
    %39 = vector.shape_cast %34 : vector<1x256xf32> to vector<1x256xf32>
    %40 = vector.broadcast %39 : vector<1x256xf32> to vector<8x256xf32>
    %41 = arith.select %38, %40, %28 : vector<8x256xi1>, vector<8x256xf32>
    %c0_i32_8 = arith.constant 0 : i32
    %42 = arith.addi %0, %c0_i32_8 : i32
    %c3_i32 = arith.constant 3 : i32
    %43 = arith.addi %42, %c3_i32 : i32
    %44 = arith.index_cast %43 : i32 to index
    %45 = memref.load %arg1[%44] : memref<16xi32, #tpu.memory_space<smem>>
    %46 = arith.index_cast %45 : i32 to index
    %c0_9 = arith.constant 0 : index
    %47 = vector.load %arg2[%46, %c0_9] : memref<100x256xf32, #tpu.memory_space<vmem>>, vector<1x256xf32>
    %c3_i32_10 = arith.constant 3 : i32
    %48 = vector.broadcast %c3_i32_10 : i32 to vector<8x1xi32>
    %49 = arith.cmpi eq, %1, %48 : vector<8x1xi32>
    %50 = vector.shape_cast %49 : vector<8x1xi1> to vector<8x1xi1>
    %51 = vector.broadcast %50 : vector<8x1xi1> to vector<8x256xi1>
    %52 = vector.shape_cast %47 : vector<1x256xf32> to vector<1x256xf32>
    %53 = vector.broadcast %52 : vector<1x256xf32> to vector<8x256xf32>
    %54 = arith.select %51, %53, %41 : vector<8x256xi1>, vector<8x256xf32>
    %c0_i32_11 = arith.constant 0 : i32
    %55 = arith.addi %0, %c0_i32_11 : i32
    %c4_i32 = arith.constant 4 : i32
    %56 = arith.addi %55, %c4_i32 : i32
    %57 = arith.index_cast %56 : i32 to index
    %58 = memref.load %arg1[%57] : memref<16xi32, #tpu.memory_space<smem>>
    %59 = arith.index_cast %58 : i32 to index
    %c0_12 = arith.constant 0 : index
    %60 = vector.load %arg2[%59, %c0_12] : memref<100x256xf32, #tpu.memory_space<vmem>>, vector<1x256xf32>
    %c4_i32_13 = arith.constant 4 : i32
    %61 = vector.broadcast %c4_i32_13 : i32 to vector<8x1xi32>
    %62 = arith.cmpi eq, %1, %61 : vector<8x1xi32>
    %63 = vector.shape_cast %62 : vector<8x1xi1> to vector<8x1xi1>
    %64 = vector.broadcast %63 : vector<8x1xi1> to vector<8x256xi1>
    %65 = vector.shape_cast %60 : vector<1x256xf32> to vector<1x256xf32>
    %66 = vector.broadcast %65 : vector<1x256xf32> to vector<8x256xf32>
    %67 = arith.select %64, %66, %54 : vector<8x256xi1>, vector<8x256xf32>
    %c0_i32_14 = arith.constant 0 : i32
    %68 = arith.addi %0, %c0_i32_14 : i32
    %c5_i32 = arith.constant 5 : i32
    %69 = arith.addi %68, %c5_i32 : i32
    %70 = arith.index_cast %69 : i32 to index
    %71 = memref.load %arg1[%70] : memref<16xi32, #tpu.memory_space<smem>>
    %72 = arith.index_cast %71 : i32 to index
    %c0_15 = arith.constant 0 : index
    %73 = vector.load %arg2[%72, %c0_15] : memref<100x256xf32, #tpu.memory_space<vmem>>, vector<1x256xf32>
    %c5_i32_16 = arith.constant 5 : i32
    %74 = vector.broadcast %c5_i32_16 : i32 to vector<8x1xi32>
    %75 = arith.cmpi eq, %1, %74 : vector<8x1xi32>
    %76 = vector.shape_cast %75 : vector<8x1xi1> to vector<8x1xi1>
    %77 = vector.broadcast %76 : vector<8x1xi1> to vector<8x256xi1>
    %78 = vector.shape_cast %73 : vector<1x256xf32> to vector<1x256xf32>
    %79 = vector.broadcast %78 : vector<1x256xf32> to vector<8x256xf32>
    %80 = arith.select %77, %79, %67 : vector<8x256xi1>, vector<8x256xf32>
    %c0_i32_17 = arith.constant 0 : i32
    %81 = arith.addi %0, %c0_i32_17 : i32
    %c6_i32 = arith.constant 6 : i32
    %82 = arith.addi %81, %c6_i32 : i32
    %83 = arith.index_cast %82 : i32 to index
    %84 = memref.load %arg1[%83] : memref<16xi32, #tpu.memory_space<smem>>
    %85 = arith.index_cast %84 : i32 to index
    %c0_18 = arith.constant 0 : index
    %86 = vector.load %arg2[%85, %c0_18] : memref<100x256xf32, #tpu.memory_space<vmem>>, vector<1x256xf32>
    %c6_i32_19 = arith.constant 6 : i32
    %87 = vector.broadcast %c6_i32_19 : i32 to vector<8x1xi32>
    %88 = arith.cmpi eq, %1, %87 : vector<8x1xi32>
    %89 = vector.shape_cast %88 : vector<8x1xi1> to vector<8x1xi1>
    %90 = vector.broadcast %89 : vector<8x1xi1> to vector<8x256xi1>
    %91 = vector.shape_cast %86 : vector<1x256xf32> to vector<1x256xf32>
    %92 = vector.broadcast %91 : vector<1x256xf32> to vector<8x256xf32>
    %93 = arith.select %90, %92, %80 : vector<8x256xi1>, vector<8x256xf32>
    %c0_i32_20 = arith.constant 0 : i32
    %94 = arith.addi %0, %c0_i32_20 : i32
    %c7_i32 = arith.constant 7 : i32
    %95 = arith.addi %94, %c7_i32 : i32
    %96 = arith.index_cast %95 : i32 to index
    %97 = memref.load %arg1[%96] : memref<16xi32, #tpu.memory_space<smem>>
    %98 = arith.index_cast %97 : i32 to index
    %c0_21 = arith.constant 0 : index
    %99 = vector.load %arg2[%98, %c0_21] : memref<100x256xf32, #tpu.memory_space<vmem>>, vector<1x256xf32>
    %c7_i32_22 = arith.constant 7 : i32
    %100 = vector.broadcast %c7_i32_22 : i32 to vector<8x1xi32>
    %101 = arith.cmpi eq, %1, %100 : vector<8x1xi32>
    %102 = vector.shape_cast %101 : vector<8x1xi1> to vector<8x1xi1>
    %103 = vector.broadcast %102 : vector<8x1xi1> to vector<8x256xi1>
    %104 = vector.shape_cast %99 : vector<1x256xf32> to vector<1x256xf32>
    %105 = vector.broadcast %104 : vector<1x256xf32> to vector<8x256xf32>
    %106 = arith.select %103, %105, %93 : vector<8x256xi1>, vector<8x256xf32>
    %cst_23 = arith.constant 0.000000e+00 : f32
    %107 = vector.broadcast %cst_23 : f32 to vector<8x256xf32>
    %c8_i32 = arith.constant 8 : i32
    %108 = arith.addi %0, %c8_i32 : i32
    %c0_i32_24 = arith.constant 0 : i32
    %109 = arith.addi %108, %c0_i32_24 : i32
    %110 = arith.index_cast %109 : i32 to index
    %111 = memref.load %arg1[%110] : memref<16xi32, #tpu.memory_space<smem>>
    %112 = arith.index_cast %111 : i32 to index
    %c0_25 = arith.constant 0 : index
    %113 = vector.load %arg2[%112, %c0_25] : memref<100x256xf32, #tpu.memory_space<vmem>>, vector<1x256xf32>
    %c0_i32_26 = arith.constant 0 : i32
    %114 = vector.broadcast %c0_i32_26 : i32 to vector<8x1xi32>
    %115 = arith.cmpi eq, %1, %114 : vector<8x1xi32>
    %116 = vector.shape_cast %115 : vector<8x1xi1> to vector<8x1xi1>
    %117 = vector.broadcast %116 : vector<8x1xi1> to vector<8x256xi1>
    %118 = vector.shape_cast %113 : vector<1x256xf32> to vector<1x256xf32>
    %119 = vector.broadcast %118 : vector<1x256xf32> to vector<8x256xf32>
    %120 = arith.select %117, %119, %107 : vector<8x256xi1>, vector<8x256xf32>
    %c8_i32_27 = arith.constant 8 : i32
    %121 = arith.addi %0, %c8_i32_27 : i32
    %c1_i32_28 = arith.constant 1 : i32
    %122 = arith.addi %121, %c1_i32_28 : i32
    %123 = arith.index_cast %122 : i32 to index
    %124 = memref.load %arg1[%123] : memref<16xi32, #tpu.memory_space<smem>>
    %125 = arith.index_cast %124 : i32 to index
    %c0_29 = arith.constant 0 : index
    %126 = vector.load %arg2[%125, %c0_29] : memref<100x256xf32, #tpu.memory_space<vmem>>, vector<1x256xf32>
    %c1_i32_30 = arith.constant 1 : i32
    %127 = vector.broadcast %c1_i32_30 : i32 to vector<8x1xi32>
    %128 = arith.cmpi eq, %1, %127 : vector<8x1xi32>
    %129 = vector.shape_cast %128 : vector<8x1xi1> to vector<8x1xi1>
    %130 = vector.broadcast %129 : vector<8x1xi1> to vector<8x256xi1>
    %131 = vector.shape_cast %126 : vector<1x256xf32> to vector<1x256xf32>
    %132 = vector.broadcast %131 : vector<1x256xf32> to vector<8x256xf32>
    %133 = arith.select %130, %132, %120 : vector<8x256xi1>, vector<8x256xf32>
    %c8_i32_31 = arith.constant 8 : i32
    %134 = arith.addi %0, %c8_i32_31 : i32
    %c2_i32_32 = arith.constant 2 : i32
    %135 = arith.addi %134, %c2_i32_32 : i32
    %136 = arith.index_cast %135 : i32 to index
    %137 = memref.load %arg1[%136] : memref<16xi32, #tpu.memory_space<smem>>
    %138 = arith.index_cast %137 : i32 to index
    %c0_33 = arith.constant 0 : index
    %139 = vector.load %arg2[%138, %c0_33] : memref<100x256xf32, #tpu.memory_space<vmem>>, vector<1x256xf32>
    %c2_i32_34 = arith.constant 2 : i32
    %140 = vector.broadcast %c2_i32_34 : i32 to vector<8x1xi32>
    %141 = arith.cmpi eq, %1, %140 : vector<8x1xi32>
    %142 = vector.shape_cast %141 : vector<8x1xi1> to vector<8x1xi1>
    %143 = vector.broadcast %142 : vector<8x1xi1> to vector<8x256xi1>
    %144 = vector.shape_cast %139 : vector<1x256xf32> to vector<1x256xf32>
    %145 = vector.broadcast %144 : vector<1x256xf32> to vector<8x256xf32>
    %146 = arith.select %143, %145, %133 : vector<8x256xi1>, vector<8x256xf32>
    %c8_i32_35 = arith.constant 8 : i32
    %147 = arith.addi %0, %c8_i32_35 : i32
    %c3_i32_36 = arith.constant 3 : i32
    %148 = arith.addi %147, %c3_i32_36 : i32
    %149 = arith.index_cast %148 : i32 to index
    %150 = memref.load %arg1[%149] : memref<16xi32, #tpu.memory_space<smem>>
    %151 = arith.index_cast %150 : i32 to index
    %c0_37 = arith.constant 0 : index
    %152 = vector.load %arg2[%151, %c0_37] : memref<100x256xf32, #tpu.memory_space<vmem>>, vector<1x256xf32>
    %c3_i32_38 = arith.constant 3 : i32
    %153 = vector.broadcast %c3_i32_38 : i32 to vector<8x1xi32>
    %154 = arith.cmpi eq, %1, %153 : vector<8x1xi32>
    %155 = vector.shape_cast %154 : vector<8x1xi1> to vector<8x1xi1>
    %156 = vector.broadcast %155 : vector<8x1xi1> to vector<8x256xi1>
    %157 = vector.shape_cast %152 : vector<1x256xf32> to vector<1x256xf32>
    %158 = vector.broadcast %157 : vector<1x256xf32> to vector<8x256xf32>
    %159 = arith.select %156, %158, %146 : vector<8x256xi1>, vector<8x256xf32>
    %c8_i32_39 = arith.constant 8 : i32
    %160 = arith.addi %0, %c8_i32_39 : i32
    %c4_i32_40 = arith.constant 4 : i32
    %161 = arith.addi %160, %c4_i32_40 : i32
    %162 = arith.index_cast %161 : i32 to index
    %163 = memref.load %arg1[%162] : memref<16xi32, #tpu.memory_space<smem>>
    %164 = arith.index_cast %163 : i32 to index
    %c0_41 = arith.constant 0 : index
    %165 = vector.load %arg2[%164, %c0_41] : memref<100x256xf32, #tpu.memory_space<vmem>>, vector<1x256xf32>
    %c4_i32_42 = arith.constant 4 : i32
    %166 = vector.broadcast %c4_i32_42 : i32 to vector<8x1xi32>
    %167 = arith.cmpi eq, %1, %166 : vector<8x1xi32>
    %168 = vector.shape_cast %167 : vector<8x1xi1> to vector<8x1xi1>
    %169 = vector.broadcast %168 : vector<8x1xi1> to vector<8x256xi1>
    %170 = vector.shape_cast %165 : vector<1x256xf32> to vector<1x256xf32>
    %171 = vector.broadcast %170 : vector<1x256xf32> to vector<8x256xf32>
    %172 = arith.select %169, %171, %159 : vector<8x256xi1>, vector<8x256xf32>
    %c8_i32_43 = arith.constant 8 : i32
    %173 = arith.addi %0, %c8_i32_43 : i32
    %c5_i32_44 = arith.constant 5 : i32
    %174 = arith.addi %173, %c5_i32_44 : i32
    %175 = arith.index_cast %174 : i32 to index
    %176 = memref.load %arg1[%175] : memref<16xi32, #tpu.memory_space<smem>>
    %177 = arith.index_cast %176 : i32 to index
    %c0_45 = arith.constant 0 : index
    %178 = vector.load %arg2[%177, %c0_45] : memref<100x256xf32, #tpu.memory_space<vmem>>, vector<1x256xf32>
    %c5_i32_46 = arith.constant 5 : i32
    %179 = vector.broadcast %c5_i32_46 : i32 to vector<8x1xi32>
    %180 = arith.cmpi eq, %1, %179 : vector<8x1xi32>
    %181 = vector.shape_cast %180 : vector<8x1xi1> to vector<8x1xi1>
    %182 = vector.broadcast %181 : vector<8x1xi1> to vector<8x256xi1>
    %183 = vector.shape_cast %178 : vector<1x256xf32> to vector<1x256xf32>
    %184 = vector.broadcast %183 : vector<1x256xf32> to vector<8x256xf32>
    %185 = arith.select %182, %184, %172 : vector<8x256xi1>, vector<8x256xf32>
    %c8_i32_47 = arith.constant 8 : i32
    %186 = arith.addi %0, %c8_i32_47 : i32
    %c6_i32_48 = arith.constant 6 : i32
    %187 = arith.addi %186, %c6_i32_48 : i32
    %188 = arith.index_cast %187 : i32 to index
    %189 = memref.load %arg1[%188] : memref<16xi32, #tpu.memory_space<smem>>
    %190 = arith.index_cast %189 : i32 to index
    %c0_49 = arith.constant 0 : index
    %191 = vector.load %arg2[%190, %c0_49] : memref<100x256xf32, #tpu.memory_space<vmem>>, vector<1x256xf32>
    %c6_i32_50 = arith.constant 6 : i32
    %192 = vector.broadcast %c6_i32_50 : i32 to vector<8x1xi32>
    %193 = arith.cmpi eq, %1, %192 : vector<8x1xi32>
    %194 = vector.shape_cast %193 : vector<8x1xi1> to vector<8x1xi1>
    %195 = vector.broadcast %194 : vector<8x1xi1> to vector<8x256xi1>
    %196 = vector.shape_cast %191 : vector<1x256xf32> to vector<1x256xf32>
    %197 = vector.broadcast %196 : vector<1x256xf32> to vector<8x256xf32>
    %198 = arith.select %195, %197, %185 : vector<8x256xi1>, vector<8x256xf32>
    %c8_i32_51 = arith.constant 8 : i32
    %199 = arith.addi %0, %c8_i32_51 : i32
    %c7_i32_52 = arith.constant 7 : i32
    %200 = arith.addi %199, %c7_i32_52 : i32
    %201 = arith.index_cast %200 : i32 to index
    %202 = memref.load %arg1[%201] : memref<16xi32, #tpu.memory_space<smem>>
    %203 = arith.index_cast %202 : i32 to index
    %c0_53 = arith.constant 0 : index
    %204 = vector.load %arg2[%203, %c0_53] : memref<100x256xf32, #tpu.memory_space<vmem>>, vector<1x256xf32>
    %c7_i32_54 = arith.constant 7 : i32
    %205 = vector.broadcast %c7_i32_54 : i32 to vector<8x1xi32>
    %206 = arith.cmpi eq, %1, %205 : vector<8x1xi32>
    %207 = vector.shape_cast %206 : vector<8x1xi1> to vector<8x1xi1>
    %208 = vector.broadcast %207 : vector<8x1xi1> to vector<8x256xi1>
    %209 = vector.shape_cast %204 : vector<1x256xf32> to vector<1x256xf32>
    %210 = vector.broadcast %209 : vector<1x256xf32> to vector<8x256xf32>
    %211 = arith.select %208, %210, %198 : vector<8x256xi1>, vector<8x256xf32>
    %212 = tpu.concatenate %106, %211 in 0 : vector<8x256xf32>, vector<8x256xf32> -> vector<16x256xf32>
    %c0_55 = arith.constant 0 : index
    %c0_56 = arith.constant 0 : index
    %213 = vector.load %arg3[%c0_55, %c0_56] : memref<256x128xf32, #tpu.memory_space<vmem>>, vector<256x128xf32>
    %cst_57 = arith.constant dense<0.000000e+00> : vector<16x128xf32>
    %214 = tpu.matmul %212, %213, %cst_57 {dimension_numbers = #tpu.dot_dimension_numbers<[1], [0], [0], [1], [0, 0, 1, 1], [], []>} : vector<16x256xf32>, vector<256x128xf32>, vector<16x128xf32> -> vector<16x128xf32>
    %c0_58 = arith.constant 0 : index
    %c0_59 = arith.constant 0 : index
    %215 = vector.load %arg4[%c0_58, %c0_59] : memref<1x128xf32, #tpu.memory_space<vmem>>, vector<1x128xf32>
    %216 = vector.broadcast %215 : vector<1x128xf32> to vector<16x128xf32>
    %217 = arith.addf %214, %216 : vector<16x128xf32>
    %c0_60 = arith.constant 0 : index
    %c0_61 = arith.constant 0 : index
    %218 = vector.load %arg5[%c0_60, %c0_61] : memref<16x128xf32, #tpu.memory_space<vmem>>, vector<16x128xf32>
    tpu.vector_store %arg5[%c0_60, %c0_61], %217 {strides = array<i32>} : memref<16x128xf32, #tpu.memory_space<vmem>>, vector<16x128xf32>,
    return
  }
  func.func @transform_0(%arg0: i32, %arg1: memref<16xi32, #tpu.memory_space<smem>>) -> (i32, i32) {
    %c0_i32 = arith.constant 0 : i32
    %c0_i32_0 = arith.constant 0 : i32
    %c0_i32_1 = arith.constant 0 : i32
    return %c0_i32, %c0_i32_0 : i32, i32
  }
  func.func @transform_1(%arg0: i32, %arg1: memref<16xi32, #tpu.memory_space<smem>>) -> (i32, i32) {
    %c0_i32 = arith.constant 0 : i32
    %c0_i32_0 = arith.constant 0 : i32
    %c0_i32_1 = arith.constant 0 : i32
    return %c0_i32, %c0_i32_0 : i32, i32
  }
  func.func @transform_2(%arg0: i32, %arg1: memref<16xi32, #tpu.memory_space<smem>>) -> (i32, i32) {
    %c0_i32 = arith.constant 0 : i32
    %c0_i32_0 = arith.constant 0 : i32
    %c0_i32_1 = arith.constant 0 : i32
    return %c0_i32, %c0_i32_0 : i32, i32
  }
  func.func @transform_3(%arg0: i32, %arg1: memref<16xi32, #tpu.memory_space<smem>>) -> (i32, i32) {
    %c0_i32 = arith.constant 0 : i32
    %c0_i32_0 = arith.constant 0 : i32
    return %arg0, %c0_i32 : i32, i32
  }
}

</mosaic_0001>

<bundles_post_ra>
// kernel: tpu_custom_call.1
= control target key start
LH: loop header
LB: loop body
LE: loop exit
PB: predicated region body
PF: predicated region fallthrough
CT: control target
= control target key end

     0   :  { %s858_s15 = smov [#allocation3]   ;;  %s1082_s0 = inlined_call_operand.hbm [shape: s32[16], index: 0, kind: input, shape index: {}]   ;;  %s1083_s1 = inlined_call_operand.hbm [shape: f32[100,256], index: 1, kind: input, shape index: {}]   ;;  %s1084_s2 = inlined_call_operand.hbm [shape: f32[256,128], index: 2, kind: input, shape index: {}]   ;;  %s1085_s3 = inlined_call_operand.vmem [shape: f32[1,128], index: 3, kind: input, shape index: {}]   ;;  %s1086_s4 = inlined_call_operand.hbm [shape: f32[16,128], index: 4, kind: output, shape index: {}]  }
   0x1   :  { %10 = dma.hbm_to_smem %s1082_s0, 16, %s858_s15, [#allocation2] }
   0x2   :  { %850 = dma.done.wait [#allocation2], 16 }
   0x3   :  { %851 = vsyncadd [#allocation2], 4294967280 }
   0x4   :  { %12 = sfence }
   0x5   :  { %13 = vsyncpa [#allocation5], 0 }
   0x6   :  { %14 = vsyncpa [#allocation8], 0 }
   0x7   :  { %15 = vsyncpa [#allocation6], 0  ;;  %s859_s18 = smov [#allocation4]  }
   0x8   :  { %s21_s19 = sshll.u32 %s859_s18, 4  ;;  %s22_s19 = int_to_ptr.vmem [resolvable:$true] %s21_s19 }
   0x9   :  { %s798_s20 = scalar_lea.vmem %s22_s19, 3328  ;;  %p803_p1 = scmp.lt.s32.totalorder %s22_s19, %s22_s19 }
   0xa   :  { %p799_p0 = scmp.ne.s32.totalorder %s22_s19, %s798_s20  ;;  %p804_p2 = scmp.lt.s32.totalorder %s798_s20, %s798_s20 }
   0xc   :  { %p805_p3 = por %p804_p2, %p803_p1 }
   0xe   :  { %p806_p4 = pnand %p805_p3, %p799_p0 }
  0x10   :  { %809 = shalt.err (!%p806_p4)
}
  0x11   :  { %s860_s21 = smov 256   ;;  %s861_s22 = smov 16  }
  0x12   :  { %27 = dma.hbm_to_vmem [thread:$0]  %s1083_s1, 3328, %s22_s19, [#allocation5], %s860_s21, %s860_s21, %s861_s22  }
  0x13   :  { %s862_s24 = smov [#allocation7]  }
  0x14   :  { %s33_s25 = sshll.u32 %s862_s24, 4  ;;  %s34_s25 = int_to_ptr.vmem [resolvable:$true] %s33_s25 }
  0x15   :  { %s818_s26 = scalar_lea.vmem %s34_s25, 4096  ;;  %p823_p6 = scmp.lt.s32.totalorder %s34_s25, %s34_s25 }
  0x16   :  { %p819_p5 = scmp.ne.s32.totalorder %s34_s25, %s818_s26  ;;  %p824_p7 = scmp.lt.s32.totalorder %s818_s26, %s818_s26 }
  0x18   :  { %p825_p8 = por %p824_p7, %p823_p6 }
  0x1a   :  { %p826_p9 = pnand %p825_p8, %p819_p5 }
  0x1c   :  { %829 = shalt.err (!%p826_p9)
}
  0x1d   :  { %s863_s27 = smov 128   ;;  %s864_s28 = smov 8  }
  0x1e   :  { %39 = dma.hbm_to_vmem [thread:$0]  %s1084_s2, 4096, %s34_s25, [#allocation8], %s863_s27, %s863_s27, %s864_s28  }
  0x1f   :  { %852 = dma.done.wait [#allocation5], 3328  }
  0x20   :  { %853 = vsyncadd [#allocation5], 4294963968 }
  0x21   :  { %854 = dma.done.wait [#allocation8], 4096  }
  0x22   :  { %855 = vsyncadd [#allocation8], 4294963200  ;;  %s51_s1 = sld [smem:[#allocation3]]  ;;  %v49_v0 = vlaneseq  ;;  %v489_v1 = vld [vmem:[#allocation7 + $0xf8] sm:$0xff]  ;;  %v488_v3 = vld [vmem:[#allocation7 + $0xf0] sm:$0xff] }
  0x23   :  { %s903_s5 = sld [smem:[#allocation3 + $0x1]]  ;;  %v473_v2 = vld [vmem:[#allocation7 + $0x78] sm:$0xff]  ;;  %704 = vmatprep.subr.mxu0 %v489_v1  ;;  %742 = vmatprep.subr.mxu1 %v489_v1  ;;  %v472_v4 = vld [vmem:[#allocation7 + $0x70] sm:$0xff]  ;;  %v487_v5 = vld [vmem:[#allocation7 + $0xe8] sm:$0xff] }
  0x24   :  { %s905_s6 = sld [smem:[#allocation3 + $0x2]]  ;;  %705 = vmatpush3.msra.mxu0 %v473_v2  ;;  %758 = vmatpush3.msra.mxu1 %v473_v2  ;;  %v471_v6 = vld [vmem:[#allocation7 + $0x68] sm:$0xff]  ;;  %v917_v7 = vshrl.u32 %v49_v0, 7  ;;  %v486_v8 = vld [vmem:[#allocation7 + $0xe0] sm:$0xff]  ;;  %v485_v10 = vld [vmem:[#allocation7 + $0xd8] sm:$0xff] }
  0x25   :  { %s907_s7 = sld [smem:[#allocation3 + $0x3]]  ;;  %706 = vmatprep.subr.mxu0 %v488_v3  ;;  %743 = vmatprep.subr.mxu1 %v488_v3  ;;  %v470_v9 = vld [vmem:[#allocation7 + $0x60] sm:$0xff]  ;;  %v469_v11 = vld [vmem:[#allocation7 + $0x58] sm:$0xff]  ;;  %v484_v14 = vld [vmem:[#allocation7 + $0xd0] sm:$0xff] }
  0x26   :  { %s909_s8 = sld [smem:[#allocation3 + $0x4]]  ;;  %707 = vmatpush3.msra.mxu0 %v472_v4  ;;  %759 = vmatpush3.msra.mxu1 %v472_v4  ;;  %v925_v12 = vsub.s32 0, %v917_v7  ;;  %v928_v13 = vsub.s32 1, %v917_v7  ;;  %v468_v15 = vld [vmem:[#allocation7 + $0x50] sm:$0xff]  ;;  %vm61_vm0 = vcmp.eq.s32.totalorder %v917_v7, 0  ;;  %vm88_vm1 = vcmp.eq.s32.totalorder %v917_v7, 1 }
  0x27   :  { %s911_s9 = sld [smem:[#allocation3 + $0x5]]  ;;  %708 = vmatprep.subr.mxu0 %v487_v5  ;;  %744 = vmatprep.subr.mxu1 %v487_v5  ;;  %v483_v16 = vld [vmem:[#allocation7 + $0xc8] sm:$0xff]  ;;  %v482_v23 = vld [vmem:[#allocation7 + $0xc0] sm:$0xff]  ;;  %vm115_vm2 = vcmp.eq.s32.totalorder %v917_v7, 2  ;;  %v481_v32 = vld [vmem:[#allocation7 + $0xb8] sm:$0xff]  ;;  %vm142_vm3 = vcmp.eq.s32.totalorder %v917_v7, 3 }
  0x28   :  { %s52_s2 = sshra.s32 %s51_s1, 3  ;;  %s55_s10 = sand.u32 7, %s51_s1  ;;  %709 = vmatpush3.msra.mxu0 %v471_v6  ;;  %760 = vmatpush3.msra.mxu1 %v471_v6  ;;  %v467_v17 = vld [vmem:[#allocation7 + $0x48] sm:$0xff]  ;;  %v466_v28 = vld [vmem:[#allocation7 + $0x40] sm:$0xff]  ;;  %v465_v33 = vld [vmem:[#allocation7 + $0x38] sm:$0xff]  ;;  %vm169_vm4 = vcmp.eq.s32.totalorder %v917_v7, 4 }
  0x29   :  { %s688_s11 = sshll.u32 %s52_s2, 4  ;;  %s79_s12 = sshra.s32 %s903_s5, 3  ;;  %710 = vmatprep.subr.mxu0 %v486_v8  ;;  %745 = vmatprep.subr.mxu1 %v486_v8  ;;  %v480_v39 = vld [vmem:[#allocation7 + $0xb0] sm:$0xff]  ;;  %v479_v43 = vld [vmem:[#allocation7 + $0xa8] sm:$0xff]  ;;  %v478_v50 = vld [vmem:[#allocation7 + $0xa0] sm:$0xff]  ;;  %vm196_vm5 = vcmp.eq.s32.totalorder %v917_v7, 5 }
  0x2a   :  { %s914_s13 = sadd.s32 %s688_s11, %s55_s10  ;;  %s82_s14 = sand.u32 7, %s903_s5  ;;  %711 = vmatpush3.msra.mxu0 %v470_v9  ;;  %761 = vmatpush3.msra.mxu1 %v470_v9  ;;  %v464_v42 = vld [vmem:[#allocation7 + $0x30] sm:$0xff]  ;;  %v463_v47 = vld [vmem:[#allocation7 + $0x28] sm:$0xff]  ;;  %v462_v51 = vld [vmem:[#allocation7 + $0x20] sm:$0xff]  ;;  %vm223_vm6 = vcmp.eq.s32.totalorder %v917_v7, 6  ;;  %vm250_vm7 = vcmp.eq.s32.totalorder %v917_v7, 7 }
  0x2b   :  { %s689_s15 = sshll.u32 %s79_s12, 4  ;;  %s106_s17 = sshra.s32 %s905_s6, 3  ;;  %712 = vmatprep.subr.mxu0 %v485_v10  ;;  %746 = vmatprep.subr.mxu1 %v485_v10  ;;  %v477_v54 = vld [vmem:[#allocation7 + $0x98] sm:$0xff]  ;;  %v476_v58 = vld [vmem:[#allocation7 + $0x90] sm:$0xff]  ;;  %v475_v63 = vld [vmem:[#allocation7 + $0x88] sm:$0xff] }
  0x2c   :  { %s919_s16 = sadd.s32 %s689_s15, %s82_s14  ;;  %s109_s18 = sand.u32 7, %s905_s6  ;;  %713 = vmatpush3.msra.mxu0 %v469_v11  ;;  %762 = vmatpush3.msra.mxu1 %v469_v11  ;;  %v461_v57 = vld [vmem:[#allocation7 + $0x18] sm:$0xff]  ;;  %v460_v59 = vld [vmem:[#allocation7 + $0x10] sm:$0xff]  ;;  %v459_v2 = vld [vmem:[#allocation7 + $0x8] sm:$0xff] }
  0x2d   :  { %s690_s19 = sshll.u32 %s106_s17, 4  ;;  %s133_s20 = sshra.s32 %s907_s7, 3  ;;  %714 = vmatprep.subr.mxu0 %v484_v14  ;;  %747 = vmatprep.subr.mxu1 %v484_v14  ;;  %v474_v4 = vld [vmem:[#allocation7 + $0x80] sm:$0xff] }
  0x2e   :  { %s112_s21 = sadd.s32 %s690_s19, %s109_s18  ;;  %s136_s22 = sand.u32 7, %s907_s7  ;;  %715 = vmatpush3.msra.mxu0 %v468_v15  ;;  %763 = vmatpush3.msra.mxu1 %v468_v15  ;;  %v458_v9 = vld [vmem:[#allocation7] sm:$0xff] }
  0x2f   :  { %s691_s23 = sshll.u32 %s133_s20, 4  ;;  %s160_s24 = sshra.s32 %s909_s8, 3  ;;  %716 = vmatprep.subr.mxu0 %v483_v16  ;;  %748 = vmatprep.subr.mxu1 %v483_v16 }
  0x30   :  { %s139_s0 = sadd.s32 %s691_s23, %s136_s22  ;;  %s59_s25 = scalar_lea.vmem [#allocation4], %s914_s13  ;;  %717 = vmatpush3.msra.mxu0 %v467_v17  ;;  %764 = vmatpush3.msra.mxu1 %v467_v17 }
  0x31   :  { %v60_v18 = vld [vmem:[%s59_s25] ss:$8 sm:$0x3]  ;;  %s86_s26 = scalar_lea.vmem [#allocation4], %s919_s16  ;;  %s113_s29 = scalar_lea.vmem [#allocation4], %s112_s21  ;;  %718 = vmatprep.subr.mxu0 %v482_v23  ;;  %749 = vmatprep.subr.mxu1 %v482_v23 }
  0x32   :  { %v72_v19 = vrot.slane %v60_v18, %v928_v13  ;;  %v87_v20 = vld [vmem:[%s86_s26] ss:$8 sm:$0x3]  ;;  %v68_v22 = vrot.slane %v60_v18, %v925_v12  ;;  %s140_s30 = scalar_lea.vmem [#allocation4], %s139_s0  ;;  %s163_s1 = sand.u32 7, %s909_s8  ;;  %719 = vmatpush3.msra.mxu0 %v466_v28  ;;  %765 = vmatpush3.msra.mxu1 %v466_v28 }
  0x33   :  { %v114_v21 = vld [vmem:[%s113_s29] ss:$8 sm:$0x3]  ;;  %v99_v24 = vrot.slane %v87_v20, %v928_v13  ;;  %s692_s5 = sshll.u32 %s160_s24, 4  ;;  %v95_v27 = vrot.slane %v87_v20, %v925_v12  ;;  %s187_s7 = sshra.s32 %s911_s9, 3  ;;  %720 = vmatprep.subr.mxu0 %v481_v32  ;;  %750 = vmatprep.subr.mxu1 %v481_v32 }
  0x34   :  { %v126_v25 = vrot.slane %v114_v21, %v928_v13  ;;  %v141_v26 = vld [vmem:[%s140_s30] ss:$8 sm:$0x3]  ;;  %v76_v29 = vsel %vm61_vm0, %v72_v19, 0.0  ;;  %s166_s6 = sadd.s32 %s692_s5, %s163_s1  ;;  %v75_v30 = vsel %vm61_vm0, %v68_v22, 0.0  ;;  %v122_v31 = vrot.slane %v114_v21, %v925_v12  ;;  %s190_s8 = sand.u32 7, %s911_s9  ;;  %721 = vmatpush3.msra.mxu0 %v465_v33  ;;  %766 = vmatpush3.msra.mxu1 %v465_v33 }
  0x35   :  { %v103_v34 = vsel %vm88_vm1, %v99_v24, %v76_v29  ;;  %v102_v35 = vsel %vm88_vm1, %v95_v27, %v75_v30  ;;  %v153_v36 = vrot.slane %v141_v26, %v928_v13  ;;  %s167_s2 = scalar_lea.vmem [#allocation4], %s166_s6  ;;  %s693_s10 = sshll.u32 %s187_s7, 4  ;;  %v149_v38 = vrot.slane %v141_v26, %v925_v12  ;;  %722 = vmatprep.subr.mxu0 %v480_v39 }
  0x36   :  { %v168_v37 = vld [vmem:[%s167_s2] ss:$8 sm:$0x3]  ;;  %s955_s11 = sld [smem:[#allocation3 + $0x6]]  ;;  %v130_v40 = vsel %vm115_vm2, %v126_v25, %v103_v34  ;;  %s193_s9 = sadd.s32 %s693_s10, %s190_s8  ;;  %v129_v41 = vsel %vm115_vm2, %v122_v31, %v102_v35  ;;  %751 = vmatprep.subr.mxu1 %v480_v39  ;;  %723 = vmatpush3.msra.mxu0 %v464_v42 }
  0x37   :  { %s961_s12 = sld [smem:[#allocation3 + $0x7]]  ;;  %v180_v44 = vrot.slane %v168_v37, %v928_v13  ;;  %s194_s14 = scalar_lea.vmem [#allocation4], %s193_s9  ;;  %v176_v46 = vrot.slane %v168_v37, %v925_v12  ;;  %v157_v48 = vsel %vm142_vm3, %v153_v36, %v130_v40  ;;  %v156_v49 = vsel %vm142_vm3, %v149_v38, %v129_v41  ;;  %767 = vmatpush3.msra.mxu1 %v464_v42 }
  0x38   :  { %s965_s13 = sld [smem:[#allocation3 + $0x8]]  ;;  %v195_v45 = vld [vmem:[%s194_s14] ss:$8 sm:$0x3]  ;;  %724 = vmatprep.subr.mxu0 %v479_v43  ;;  %752 = vmatprep.subr.mxu1 %v479_v43 }
  0x39   :  { %s968_s15 = sld [smem:[#allocation3 + $0x9]]  ;;  %v207_v52 = vrot.slane %v195_v45, %v928_v13  ;;  %v203_v53 = vrot.slane %v195_v45, %v925_v12  ;;  %725 = vmatpush3.msra.mxu0 %v463_v47  ;;  %768 = vmatpush3.msra.mxu1 %v463_v47  ;;  %v184_v55 = vsel %vm169_vm4, %v180_v44, %v157_v48 }
  0x3a   :  { %s974_s16 = sld [smem:[#allocation3 + $0xa]]  ;;  %v183_v56 = vsel %vm169_vm4, %v176_v46, %v156_v49  ;;  %726 = vmatprep.subr.mxu0 %v478_v50  ;;  %753 = vmatprep.subr.mxu1 %v478_v50 }
  0x3b   :  { %s978_s17 = sld [smem:[#allocation3 + $0xb]]  ;;  %727 = vmatpush3.msra.mxu0 %v462_v51  ;;  %769 = vmatpush3.msra.mxu1 %v462_v51  ;;  %v211_v60 = vsel %vm196_vm5, %v207_v52, %v184_v55  ;;  %v210_v62 = vsel %vm196_vm5, %v203_v53, %v183_v56  ;;  %v687_v56 = vld [vmem:[%s1085_s3] ss:$0 sm:$0xff] }
  0x3c   :  { %s214_s18 = sshra.s32 %s955_s11, 3  ;;  %s217_s19 = sand.u32 7, %s955_s11  ;;  %728 = vmatprep.subr.mxu0 %v477_v54  ;;  %754 = vmatprep.subr.mxu1 %v477_v54 }
  0x3d   :  { %s694_s20 = sshll.u32 %s214_s18, 4  ;;  %s241_s21 = sshra.s32 %s961_s12, 3  ;;  %729 = vmatpush3.msra.mxu0 %v461_v57  ;;  %770 = vmatpush3.msra.mxu1 %v461_v57 }
  0x3e   :  { %s220_s22 = sadd.s32 %s694_s20, %s217_s19  ;;  %s244_s23 = sand.u32 7, %s961_s12  ;;  %730 = vmatprep.subr.mxu0 %v476_v58  ;;  %755 = vmatprep.subr.mxu1 %v476_v58 }
  0x3f   :  { %s695_s0 = sshll.u32 %s241_s21, 4  ;;  %s221_s24 = scalar_lea.vmem [#allocation4], %s220_s22  ;;  %731 = vmatpush3.msra.mxu0 %v460_v59  ;;  %771 = vmatpush3.msra.mxu1 %v460_v59 }
  0x40   :  { %v222_v61 = vld [vmem:[%s221_s24] ss:$8 sm:$0x3]  ;;  %s247_s25 = sadd.s32 %s695_s0, %s244_s23  ;;  %s268_s26 = sshra.s32 %s965_s13, 3  ;;  %732 = vmatprep.subr.mxu0 %v475_v63  ;;  %756 = vmatprep.subr.mxu1 %v475_v63 }
  0x41   :  { %v234_v0 = vrot.slane %v222_v61, %v928_v13  ;;  %s271_s29 = sand.u32 7, %s965_s13  ;;  %v230_v1 = vrot.slane %v222_v61, %v925_v12  ;;  %s248_s30 = scalar_lea.vmem [#allocation4], %s247_s25  ;;  %733 = vmatpush3.msra.mxu0 %v459_v2  ;;  %772 = vmatpush3.msra.mxu1 %v459_v2 }
  0x42   :  { %v249_v3 = vld [vmem:[%s248_s30] ss:$8 sm:$0x3]  ;;  %s696_s1 = sshll.u32 %s268_s26, 4  ;;  %s292_s5 = sshra.s32 %s968_s15, 3  ;;  %734 = vmatprep.subr.mxu0 %v474_v4  ;;  %757 = vmatprep.subr.mxu1 %v474_v4 }
  0x43   :  { %v238_v5 = vsel %vm223_vm6, %v234_v0, %v211_v60  ;;  %v261_v6 = vrot.slane %v249_v3, %v928_v13  ;;  %s274_s6 = sadd.s32 %s696_s1, %s271_s29  ;;  %s295_s7 = sand.u32 7, %s968_s15  ;;  %v237_v8 = vsel %vm223_vm6, %v230_v1, %v210_v62  ;;  %v257_v10 = vrot.slane %v249_v3, %v925_v12  ;;  %735 = vmatpush3.msra.mxu0 %v458_v9 }
  0x44   :  { %s697_s8 = sshll.u32 %s292_s5, 4  ;;  %s275_s2 = scalar_lea.vmem [#allocation4], %s274_s6  ;;  %773 = vmatpush3.msra.mxu1 %v458_v9 }
  0x45   :  { %v265_v11 = vsel %vm250_vm7, %v261_v6, %v238_v5  ;;  %v276_v14 = vld [vmem:[%s275_s2] ss:$8 sm:$0x3]  ;;  %s298_s10 = sadd.s32 %s697_s8, %s295_s7  ;;  %s316_s11 = sshra.s32 %s974_s16, 3  ;;  %v264_v15 = vsel %vm250_vm7, %v257_v10, %v237_v8 }
  0x46   :  { %s319_s9 = sand.u32 7, %s974_s16  ;;  %v285_v16 = vrot.slane %v276_v14, %v928_v13  ;;  %s299_s12 = scalar_lea.vmem [#allocation4], %s298_s10  ;;  %v281_v18 = vrot.slane %v276_v14, %v925_v12  ;;  %561 = vmatprep.mubr.f32.mxu0 %v265_v11 }
  0x47   :  { %v300_v17 = vld [vmem:[%s299_s12] ss:$8 sm:$0x3]  ;;  %s698_s13 = sshll.u32 %s316_s11, 4  ;;  %s340_s14 = sshra.s32 %s978_s17, 3  ;;  %562 = vmatmul.mubr.f32.vlgmr.msra.gmra.mxu0 %v264_v15 }
  0x48   :  { %s322_s15 = sadd.s32 %s698_s13, %s319_s9  ;;  %s343_s18 = sand.u32 7, %s978_s17  ;;  %v309_v19 = vrot.slane %v300_v17, %v928_v13  ;;  %v305_v21 = vrot.slane %v300_v17, %v925_v12  ;;  %v289_v22 = vsel %vm61_vm0, %v285_v16, 0.0  ;;  %v288_v23 = vsel %vm61_vm0, %v281_v18, 0.0 }
  0x49   :  { %s699_s19 = sshll.u32 %s340_s14, 4  ;;  %s323_s16 = scalar_lea.vmem [#allocation4], %s322_s15 }
  0x4a   :  { %v324_v20 = vld [vmem:[%s323_s16] ss:$8 sm:$0x3]  ;;  %s346_s20 = sadd.s32 %s699_s19, %s343_s18  ;;  %s675_s21 = sld [smem:[#allocation3 + $0xc]]  ;;  %v313_v27 = vsel %vm88_vm1, %v309_v19, %v289_v22  ;;  %v312_v28 = vsel %vm88_vm1, %v305_v21, %v288_v23 }
  0x4b   :  { %s678_s22 = sld [smem:[#allocation3 + $0xd]]  ;;  %v333_v24 = vrot.slane %v324_v20, %v928_v13  ;;  %s347_s17 = scalar_lea.vmem [#allocation4], %s346_s20  ;;  %v329_v26 = vrot.slane %v324_v20, %v925_v12 }
  0x4c   :  { %s1025_s23 = sld [smem:[#allocation3 + $0xe]]  ;;  %v348_v25 = vld [vmem:[%s347_s17] ss:$8 sm:$0x3] }
  0x4d   :  { %s1031_s0 = sld [smem:[#allocation3 + $0xf]]  ;;  %v357_v29 = vrot.slane %v348_v25, %v928_v13  ;;  %v353_v30 = vrot.slane %v348_v25, %v925_v12  ;;  %v337_v31 = vsel %vm115_vm2, %v333_v24, %v313_v27  ;;  %v336_v32 = vsel %vm115_vm2, %v329_v26, %v312_v28 }
  0x4f   :  { %v361_v33 = vsel %vm142_vm3, %v357_v29, %v337_v31  ;;  %v360_v35 = vsel %vm142_vm3, %v353_v30, %v336_v32 }
  0x50   :  { %s364_s24 = sshra.s32 %s675_s21, 3  ;;  %s367_s25 = sand.u32 7, %s675_s21 }
  0x51   :  { %s700_s26 = sshll.u32 %s364_s24, 4  ;;  %s388_s29 = sshra.s32 %s678_s22, 3 }
  0x52   :  { %s370_s30 = sadd.s32 %s700_s26, %s367_s25  ;;  %s391_s1 = sand.u32 7, %s678_s22 }
  0x53   :  { %s701_s5 = sshll.u32 %s388_s29, 4  ;;  %s371_s6 = scalar_lea.vmem [#allocation4], %s370_s30 }
  0x54   :  { %v372_v34 = vld [vmem:[%s371_s6] ss:$8 sm:$0x3]  ;;  %s394_s7 = sadd.s32 %s701_s5, %s391_s1  ;;  %s412_s8 = sshra.s32 %s1025_s23, 3 }
  0x55   :  { %v381_v36 = vrot.slane %v372_v34, %v928_v13  ;;  %s415_s2 = sand.u32 7, %s1025_s23  ;;  %v377_v37 = vrot.slane %v372_v34, %v925_v12  ;;  %s395_s10 = scalar_lea.vmem [#allocation4], %s394_s7 }
  0x56   :  { %v396_v38 = vld [vmem:[%s395_s10] ss:$8 sm:$0x3]  ;;  %s702_s11 = sshll.u32 %s412_s8, 4  ;;  %s436_s9 = sshra.s32 %s1031_s0, 3 }
  0x57   :  { %v385_v39 = vsel %vm169_vm4, %v381_v36, %v361_v33  ;;  %v405_v40 = vrot.slane %v396_v38, %v928_v13  ;;  %s418_s12 = sadd.s32 %s702_s11, %s415_s2  ;;  %s439_s13 = sand.u32 7, %s1031_s0  ;;  %v384_v41 = vsel %vm169_vm4, %v377_v37, %v360_v35  ;;  %v401_v42 = vrot.slane %v396_v38, %v925_v12 }
  0x58   :  { %s703_s14 = sshll.u32 %s436_s9, 4  ;;  %s419_s15 = scalar_lea.vmem [#allocation4], %s418_s12 }
  0x59   :  { %v409_v43 = vsel %vm196_vm5, %v405_v40, %v385_v39  ;;  %v420_v44 = vld [vmem:[%s419_s15] ss:$8 sm:$0x3]  ;;  %s442_s18 = sadd.s32 %s703_s14, %s439_s13  ;;  %v408_v45 = vsel %vm196_vm5, %v401_v42, %v384_v41  ;;  %s865_s21 = smov [#allocation9]  }
  0x5a   :  { %v429_v46 = vrot.slane %v420_v44, %v928_v13  ;;  %v425_v47 = vrot.slane %v420_v44, %v925_v12  ;;  %s443_s19 = scalar_lea.vmem [#allocation4], %s442_s18  ;;  %s579_s22 = sshll.u32 %s865_s21, 4  ;;  %s580_s22 = int_to_ptr.vmem [resolvable:$true] %s579_s22 }
  0x5b   :  { %v444_v48 = vld [vmem:[%s443_s19] ss:$8 sm:$0x3]  ;;  %s830_s23 = scalar_lea.vmem %s580_s22, 256  ;;  %p835_p11 = scmp.lt.s32.totalorder %s580_s22, %s580_s22 }
  0x5c   :  { %v433_v49 = vsel %vm223_vm6, %v429_v46, %v409_v43  ;;  %v453_v50 = vrot.slane %v444_v48, %v928_v13  ;;  %v432_v51 = vsel %vm223_vm6, %v425_v47, %v408_v45  ;;  %v449_v52 = vrot.slane %v444_v48, %v925_v12  ;;  %p831_p10 = scmp.ne.s32.totalorder %s580_s22, %s830_s23  ;;  %p836_p12 = scmp.lt.s32.totalorder %s830_s23, %s830_s23 }
  0x5e   :  { %v457_v53 = vsel %vm250_vm7, %v453_v50, %v433_v49  ;;  %v456_v54 = vsel %vm250_vm7, %v449_v52, %v432_v51  ;;  %p837_p13 = por %p836_p12, %p835_p11 }
  0x5f   :  { %566 = vmatprep.mubr.f32.mxu1 %v457_v53 }
  0x60   :  { %567 = vmatmul.mubr.f32.vlgmr.msra.gmra.mxu1 %v456_v54  ;;  %p838_p0 = pnand %p837_p13, %p831_p10 }
 0x107   :  { %v736_v55 = vpop.f32.mrf.mxu0 }
 0x109   :  { %v737_v57 = vpop.f32.mrf.mxu0 }
 0x10a   :  { %v738_v13 = vadd.f32 %v737_v57, %v736_v55 }
 0x10c   :  { %v564_v58 = vadd.f32 %v738_v13, %v687_v56 }
 0x10e   :  { %572 = vst [vmem:[#allocation9] sm:$0xff] %v564_v58 }
 0x120   :  { %v739_v59 = vpop.f32.mrf.mxu1 }
 0x122   :  { %v740_v60 = vpop.f32.mrf.mxu1 }
 0x123   :  { %v741_v12 = vadd.f32 %v740_v60, %v739_v59 }
 0x125   :  { %v569_v61 = vadd.f32 %v741_v12, %v687_v56 }
 0x127   :  { %573 = vst [vmem:[#allocation9 + $0x8] sm:$0xff] %v569_v61 }
 0x128   :  { %841 = shalt.err (!%p838_p0)
}
 0x129   :  { %585 = dma.vmem_to_hbm [thread:$0]  %s580_s22, 256, %s1086_s4, [#allocation6], %s863_s27, %s863_s27, %s864_s28  }
 0x12a   :  { %856 = dma.done.wait [#allocation6], 256  }
 0x12b   :  { %857 = vsyncadd [#allocation6], 4294967040 }
 0x12c   :  { %589 = vsyncpa [#allocation5], 1 }
 0x12d   :  { %590 = vsyncpa [#allocation8], 1 }
 0x12e   :  { %591 = vsyncpa [#allocation6], 1 }

</bundles_post_ra>
